<compile_context>
chip_gen: v7x
topology: tpu7x:2x2x1
jax: 0.10.0
libtpu: 0.0.40
codegen_flags: <defaults>
</compile_context>

<pallas_src>
import jax
import jax.numpy as jnp
from jax.experimental import pallas as pl
from jax.experimental.pallas import tpu as pltpu


def _discriminator_kernel(x_ref, w1_ref, b1_ref, w2_ref, b2_ref, o_ref):
    # x_ref : (1, TB)  f32   batch tile on the lane axis
    # w1_ref: (H, 1)   f32   layer-1 weights as a column (== W1, in_features == 1)
    # b1_ref: (H, 1)   f32   layer-1 bias as a column
    # w2_ref: (H, 1)   f32   layer-2 weights as a column (== W2.T, out_features == 1)
    # b2_ref: (1, 1)   f32   scalar layer-2 bias (SMEM)
    # o_ref : (1, TB)  f32   lane-dense output tile
    x = x_ref[...]                                              # (1, TB)

    # Layer 1 + ReLU: h[j, i] = relu(w1[j] * x[i] + b1[j])      (VPU broadcast)
    h = jnp.maximum(w1_ref[...] * x + b1_ref[...], jnp.float32(0.0))  # (H, TB)

    # Layer 2: logits[i] = sum_j h[j, i] * w2[j] + b2           (sublane reduce -> XLU)
    logits = jnp.sum(h * w2_ref[...], axis=0, keepdims=True) + b2_ref[0, 0]  # (1, TB)

    # Sigmoid: exp on the EUP; approx reciprocal also on the EUP (frees VALU slots).
    o_ref[...] = pl.reciprocal(1.0 + jnp.exp(-logits), approx=True)


def discriminator_forward(x, w1, b1, w2, b2, *, max_tile=1024):
    """x: (B, 1) f32. Params follow nn.Linear shapes:
       w1: (32, 1), b1: (32,), w2: (1, 32), b2: (1,)."""
    B = x.shape[0]
    H = w1.shape[0]

    # Batch-on-lanes layout; pad B up to a multiple of the lane tile (>= 128).
    tb = min(max_tile, max(128, ((B + 127) // 128) * 128))
    b_pad = pl.cdiv(B, tb) * tb
    x_row = jnp.pad(x.reshape(1, B).astype(jnp.float32),
                    ((0, 0), (0, b_pad - B)))

    # Parameters as lane-1 columns (broadcast against the batch-on-lanes row).
    w1_col = w1.reshape(H, 1).astype(jnp.float32)
    b1_col = b1.reshape(H, 1).astype(jnp.float32)
    w2_col = w2.reshape(H, 1).astype(jnp.float32)
    b2_val = b2.reshape(1, 1).astype(jnp.float32)

    grid = (b_pad // tb,)
    # Constant index_map -> the parameter columns are DMA'd once and stay resident.
    param_spec = pl.BlockSpec((H, 1), lambda i: (0, 0))

    out = pl.pallas_call(
        _discriminator_kernel,
        out_shape=jax.ShapeDtypeStruct((1, b_pad), jnp.float32),
        grid=grid,
        in_specs=[
            pl.BlockSpec((1, tb), lambda i: (0, i)),               # x: lane-dense batch tile
            param_spec,                                            # w1
            param_spec,                                            # b1
            param_spec,                                            # w2
            pl.BlockSpec(memory_space=pltpu.MemorySpace.SMEM),     # b2: scalar in SMEM
        ],
        out_specs=pl.BlockSpec((1, tb), lambda i: (0, i)),         # lane-dense output tile
        compiler_params=pltpu.CompilerParams(
            dimension_semantics=("parallel",)),                    # v7x: shard across TCs
    )(x_row, w1_col, b1_col, w2_col, b2_val)

    return out[0, :B].reshape(B, 1)


def _reference_forward(x, w1, b1, w2, b2):
    h = jnp.maximum(x @ w1.T + b1, 0.0)
    return jax.nn.sigmoid(h @ w2.T + b2)


if __name__ == "__main__":
    key = jax.random.PRNGKey(0)
    k_x, k_w1, k_b1, k_w2, k_b2 = jax.random.split(key, 5)

    B, H = 8, 32
    x = jax.random.normal(k_x, (B, 1), dtype=jnp.float32)

    # Deterministic init mimicking nn.Linear's uniform(-1/sqrt(fan_in), 1/sqrt(fan_in))
    w1 = jax.random.uniform(k_w1, (H, 1), jnp.float32, -1.0, 1.0)        # fan_in = 1
    b1 = jax.random.uniform(k_b1, (H,), jnp.float32, -1.0, 1.0)
    bound2 = 1.0 / jnp.sqrt(jnp.float32(H))
    w2 = jax.random.uniform(k_w2, (1, H), jnp.float32, -bound2, bound2)  # fan_in = 32
    b2 = jax.random.uniform(k_b2, (1,), jnp.float32, -bound2, bound2)

    out = jax.block_until_ready(discriminator_forward(x, w1, b1, w2, b2))
    ref = _reference_forward(x, w1, b1, w2, b2)

    assert out.shape == (B, 1)
    # EUP approx reciprocal is ~1e-4 relative; output is a probability in [0, 1],
    # so a 1e-3 tolerance still validates the full linear/ReLU/sigmoid chain.
    assert jnp.allclose(out, ref, atol=1e-3, rtol=1e-3), (out, ref)

    print("KERNEL_OK")
</pallas_src>

<mosaic_0001>
module attributes {stable_mosaic.version = 11 : i64} {
  func.func @_discriminator_kernel(%arg0: i32, %arg1: memref<1x128xf32, #tpu.memory_space<vmem>>, %arg2: memref<32x1xf32, #tpu.memory_space<vmem>>, %arg3: memref<32x1xf32, #tpu.memory_space<vmem>>, %arg4: memref<32x1xf32, #tpu.memory_space<vmem>>, %arg5: memref<1x1xf32, #tpu.memory_space<smem>>, %arg6: memref<1x128xf32, #tpu.memory_space<vmem>>) attributes {dimension_semantics = [#tpu.dimension_semantics<parallel>], iteration_bounds = array<i64: 1>, scalar_prefetch = 0 : i64, scratch_operands = 0 : i64, tpu.core_type = #tpu.core_type<tc>, window_params = [{transform_indices = @transform_0, window_bounds = array<i64: 1, 128>}, {pipeline_mode = #tpu.pipeline_mode<synchronous>, transform_indices = @transform_1, window_bounds = array<i64: 32, 1>}, {pipeline_mode = #tpu.pipeline_mode<synchronous>, transform_indices = @transform_2, window_bounds = array<i64: 32, 1>}, {pipeline_mode = #tpu.pipeline_mode<synchronous>, transform_indices = @transform_3, window_bounds = array<i64: 32, 1>}, {transform_indices = @transform_4, window_bounds = array<i64: 1, 1>}, {transform_indices = @transform_5, window_bounds = array<i64: 1, 128>}]} {
    %c0 = arith.constant 0 : index
    %c0_0 = arith.constant 0 : index
    %0 = vector.load %arg1[%c0, %c0_0] : memref<1x128xf32, #tpu.memory_space<vmem>>, vector<1x128xf32>
    %c0_1 = arith.constant 0 : index
    %c0_2 = arith.constant 0 : index
    %1 = vector.load %arg2[%c0_1, %c0_2] : memref<32x1xf32, #tpu.memory_space<vmem>>, vector<32x1xf32>
    %2 = vector.broadcast %1 : vector<32x1xf32> to vector<32x128xf32>
    %3 = vector.broadcast %0 : vector<1x128xf32> to vector<32x128xf32>
    %4 = arith.mulf %2, %3 : vector<32x128xf32>
    %c0_3 = arith.constant 0 : index
    %c0_4 = arith.constant 0 : index
    %5 = vector.load %arg3[%c0_3, %c0_4] : memref<32x1xf32, #tpu.memory_space<vmem>>, vector<32x1xf32>
    %6 = vector.broadcast %5 : vector<32x1xf32> to vector<32x128xf32>
    %7 = arith.addf %4, %6 : vector<32x128xf32>
    %cst = arith.constant 0.000000e+00 : f32
    %8 = vector.broadcast %cst : f32 to vector<32x128xf32>
    %9 = arith.maximumf %7, %8 : vector<32x128xf32>
    %c0_5 = arith.constant 0 : index
    %c0_6 = arith.constant 0 : index
    %10 = vector.load %arg4[%c0_5, %c0_6] : memref<32x1xf32, #tpu.memory_space<vmem>>, vector<32x1xf32>
    %11 = vector.broadcast %10 : vector<32x1xf32> to vector<32x128xf32>
    %12 = arith.mulf %9, %11 : vector<32x128xf32>
    %cst_7 = arith.constant dense<0.000000e+00> : vector<128xf32>
    %13 = vector.multi_reduction <add>, %12, %cst_7 [0] : vector<32x128xf32> to vector<128xf32>
    %14 = vector.shape_cast %13 : vector<128xf32> to vector<1x128xf32>
    %c0_8 = arith.constant 0 : index
    %c0_9 = arith.constant 0 : index
    %15 = memref.load %arg5[%c0_8, %c0_9] : memref<1x1xf32, #tpu.memory_space<smem>>
    %16 = vector.broadcast %15 : f32 to vector<1x128xf32>
    %17 = arith.addf %14, %16 : vector<1x128xf32>
    %cst_10 = arith.constant 0.000000e+00 : f32
    %18 = vector.broadcast %cst_10 : f32 to vector<1x128xf32>
    %19 = arith.subf %18, %17 : vector<1x128xf32>
    %20 = math.exp %19 : vector<1x128xf32>
    %cst_11 = arith.constant 1.000000e+00 : f32
    %21 = vector.broadcast %cst_11 : f32 to vector<1x128xf32>
    %22 = arith.addf %21, %20 : vector<1x128xf32>
    %23 = tpu.reciprocal %22 {approx = true} : vector<1x128xf32> -> vector<1x128xf32>
    %c0_12 = arith.constant 0 : index
    %c0_13 = arith.constant 0 : index
    %24 = vector.load %arg6[%c0_12, %c0_13] : memref<1x128xf32, #tpu.memory_space<vmem>>, vector<1x128xf32>
    tpu.vector_store %arg6[%c0_12, %c0_13], %23 {strides = array<i32>} : memref<1x128xf32, #tpu.memory_space<vmem>>, vector<1x128xf32>,
    return
  }
  func.func @transform_0(%arg0: i32) -> (i32, i32) {
    %c0_i32 = arith.constant 0 : i32
    %c0_i32_0 = arith.constant 0 : i32
    return %c0_i32, %arg0 : i32, i32
  }
  func.func @transform_1(%arg0: i32) -> (i32, i32) {
    %c0_i32 = arith.constant 0 : i32
    %c0_i32_0 = arith.constant 0 : i32
    %c0_i32_1 = arith.constant 0 : i32
    return %c0_i32, %c0_i32_0 : i32, i32
  }
  func.func @transform_2(%arg0: i32) -> (i32, i32) {
    %c0_i32 = arith.constant 0 : i32
    %c0_i32_0 = arith.constant 0 : i32
    %c0_i32_1 = arith.constant 0 : i32
    return %c0_i32, %c0_i32_0 : i32, i32
  }
  func.func @transform_3(%arg0: i32) -> (i32, i32) {
    %c0_i32 = arith.constant 0 : i32
    %c0_i32_0 = arith.constant 0 : i32
    %c0_i32_1 = arith.constant 0 : i32
    return %c0_i32, %c0_i32_0 : i32, i32
  }
  func.func @transform_4(%arg0: i32) -> (i32, i32) {
    %c0_i32 = arith.constant 0 : i32
    %c0_i32_0 = arith.constant 0 : i32
    %c0_i32_1 = arith.constant 0 : i32
    return %c0_i32, %c0_i32_0 : i32, i32
  }
  func.func @transform_5(%arg0: i32) -> (i32, i32) {
    %c0_i32 = arith.constant 0 : i32
    %c0_i32_0 = arith.constant 0 : i32
    return %c0_i32, %arg0 : i32, i32
  }
}

</mosaic_0001>

<bundles_post_ra>
// kernel: tpu_custom_call.1
= control target key start
LH: loop header
LB: loop body
LE: loop exit
PB: predicated region body
PF: predicated region fallthrough
CT: control target
= control target key end

     0   :  { %v182_v2 = vmov 0   ;;  %s268_s0 = inlined_call_operand.vmem [shape: f32[1,128], index: 0, kind: input, shape index: {}]   ;;  %s269_s1 = inlined_call_operand.vmem [shape: f32[32,1], index: 1, kind: input, shape index: {}]   ;;  %s270_s2 = inlined_call_operand.vmem [shape: f32[32,1], index: 2, kind: input, shape index: {}]   ;;  %s271_s3 = inlined_call_operand.vmem [shape: f32[32,1], index: 3, kind: input, shape index: {}]   ;;  %s272_s4 = inlined_call_operand.<no memory space> [shape: f32[1,1], index: 4, kind: input, shape index: {}]   ;;  %s273_s5 = inlined_call_operand.hbm [shape: f32[1,128], index: 5, kind: output, shape index: {}]  }
   0x1   :  { %v25_v0 = vld [vmem:[%s269_s1 + $0x10] sm:$0xff]  ;;  %v23_v1 = vld [vmem:[%s269_s1] sm:$0xff]  ;;  %153 = vset.pattern.permute.xlu1 %v182_v2  ;;  %152 = vset.pattern.permute.xlu0 %v182_v2  ;;  %v24_v4 = vld [vmem:[%s269_s1 + $0x8] sm:$0xff] }
   0x2   :  { %39 = vperm.xlu1 %153, %v25_v0   ;;  %29 = vperm.xlu0 %152, %v23_v1   ;;  %v57_v3 = vld [vmem:[%s270_s2] sm:$0xff] }
   0x3   :  { %11 = vsyncpa [#allocation4], 0  ;;  %v26_v5 = vld [vmem:[%s269_s1 + $0x18] sm:$0xff]  ;;  %v58_v6 = vld [vmem:[%s270_s2 + $0x8] sm:$0xff]  ;;  %v127_v50 = vstv %s272_s4  ;;  %s183_s17 = smov [#allocation3]  }
   0x4   :  { %v60_v7 = vld [vmem:[%s270_s2 + $0x18] sm:$0xff]  ;;  %v59_v8 = vld [vmem:[%s270_s2 + $0x10] sm:$0xff]  ;;  %v90_v9 = vld [vmem:[%s271_s3 + $0x8] sm:$0xff]  ;;  %s141_s18 = sshll.u32 %s183_s17, 4  ;;  %s142_s18 = int_to_ptr.vmem [resolvable:$true] %s141_s18 }
   0x5   :  { %v89_v10 = vld [vmem:[%s271_s3] sm:$0xff]  ;;  %v92_v11 = vld [vmem:[%s271_s3 + $0x18] sm:$0xff]  ;;  %v91_v12 = vld [vmem:[%s271_s3 + $0x10] sm:$0xff]  ;;  %s158_s19 = scalar_lea.vmem %s142_s18, 16  ;;  %s162_s20 = scalar_lea.vmem %s142_s18, 32 }
   0x6   :  { %63 = vperm.xlu1 %153, %v57_v3   ;;  %34 = vperm.xlu0 %152, %v24_v4   ;;  %v149_v17 = vld [vmem:[%s268_s0] ss:$0 sm:$0xff]  ;;  %p159_p0 = scmp.ne.s32.totalorder %s142_s18, %s158_s19  ;;  %p163_p1 = scmp.lt.s32.totalorder %s142_s18, %s142_s18 }
   0x7   :  { %p164_p2 = scmp.lt.s32.totalorder %s162_s20, %s158_s19 }
   0x9   :  { %p165_p3 = por %p164_p2, %p163_p1 }
   0xa   :  { %44 = vperm.xlu1 %153, %v26_v5   ;;  %68 = vperm.xlu0 %152, %v58_v6  }
   0xb   :  { %p166_p4 = pnand %p165_p3, %p159_p0 }
   0xe   :  { %78 = vperm.xlu1 %153, %v60_v7   ;;  %73 = vperm.xlu0 %152, %v59_v8  }
  0x12   :  { %100 = vperm.xlu1 %153, %v90_v9   ;;  %95 = vperm.xlu0 %152, %v89_v10  }
  0x16   :  { %110 = vperm.xlu1 %153, %v92_v11   ;;  %105 = vperm.xlu0 %152, %v91_v12  }
  0x81   :  { %v40_v13 = vpop.permute.xlu1 %39  ;;  %v30_v14 = vpop.permute.xlu0 %29 }
  0x82   :  { %v53_v20 = vmul.f32 %v149_v17, %v30_v14  ;;  %v55_v26 = vmul.f32 %v149_v17, %v40_v13 }
  0x85   :  { %v64_v15 = vpop.permute.xlu1 %63  ;;  %v35_v16 = vpop.permute.xlu0 %34 }
  0x86   :  { %v54_v21 = vmul.f32 %v149_v17, %v35_v16  ;;  %v81_v22 = vadd.f32 %v64_v15, %v53_v20 }
  0x88   :  { %v85_v27 = vmax.f32 %v81_v22, 0.0 }
  0x89   :  { %v45_v18 = vpop.permute.xlu1 %44  ;;  %v69_v19 = vpop.permute.xlu0 %68 }
  0x8a   :  { %v82_v23 = vadd.f32 %v69_v19, %v54_v21  ;;  %v56_v28 = vmul.f32 %v149_v17, %v45_v18 }
  0x8c   :  { %v86_v29 = vmax.f32 %v82_v23, 0.0 }
  0x8d   :  { %v79_v24 = vpop.permute.xlu1 %78  ;;  %v74_v25 = vpop.permute.xlu0 %73 }
  0x8e   :  { %v83_v30 = vadd.f32 %v74_v25, %v55_v26  ;;  %v84_v33 = vadd.f32 %v79_v24, %v56_v28 }
  0x90   :  { %v87_v36 = vmax.f32 %v83_v30, 0.0  ;;  %v88_v39 = vmax.f32 %v84_v33, 0.0 }
  0x91   :  { %v101_v31 = vpop.permute.xlu1 %100  ;;  %v96_v32 = vpop.permute.xlu0 %95 }
  0x92   :  { %v114_v34 = vmul.f32 %v101_v31, %v86_v29  ;;  %v113_v35 = vmul.f32 %v96_v32, %v85_v27 }
  0x94   :  { %v117_v40 = vadd.f32 %v114_v34, %v113_v35 }
  0x95   :  { %v111_v37 = vpop.permute.xlu1 %110  ;;  %v106_v38 = vpop.permute.xlu0 %105 }
  0x96   :  { %v115_v41 = vmul.f32 %v106_v38, %v87_v36  ;;  %v116_v42 = vmul.f32 %v111_v37, %v88_v39 }
  0x98   :  { %v118_v43 = vadd.f32 %v117_v40, %v115_v41 }
  0x9a   :  { %v119_v44 = vadd.f32 %v118_v43, %v116_v42 }
  0x9c   :  { %v120_v45 = vrot.slane %v119_v44, 4 }
  0x9e   :  { %v121_v46 = vadd.f32 %v120_v45, %v119_v44 }
  0xa0   :  { %v122_v47 = vrot.slane %v121_v46, 2 }
  0xa2   :  { %v123_v48 = vadd.f32 %v122_v47, %v121_v46 }
  0xa4   :  { %v124_v49 = vrot.slane %v123_v48, 1 }
  0xa6   :  { %v125_v51 = vadd.f32 %v124_v49, %v123_v48 }
  0xa8   :  { %v128_v52 = vadd.f32 %v127_v50, %v125_v51 }
  0xaa   :  { %v129_v53 = vsub.f32 0.0, %v128_v52 }
  0xac   :  { %v130_v54 = vmul.f32 1.442695, %v129_v53 }
  0xae   :  { %154 = vpow2.f32 %v130_v54 }
  0xb8   :  { %v155_v55 = vpop.eup %154 }
  0xb9   :  { %v132_v56 = vadd.f32 1.0, %v155_v55 }
  0xbb   :  { %156 = vrcp.f32 %v132_v56 }
  0xc5   :  { %v157_v57 = vpop.eup %156 }
  0xc6   :  { %134 = vst [vmem:[#allocation3] sm:$0x1] %v157_v57 }
  0xc7   :  { %169 = shalt.err (!%p166_p4)
}
  0xc8   :  { %s170_s22 = scalar_lea.hbm %s273_s5, 16 }
  0xc9   :  { %p171_p5 = scmp.ne.s32.totalorder %s273_s5, %s170_s22  ;;  %p174_p6 = scmp.lt.u32.totalorder %s170_s22, %s273_s5 }
  0xcb   :  { %p176_p7 = pnand %p174_p6, %p171_p5 }
  0xcd   :  { %179 = shalt.err (!%p176_p7)
}
  0xce   :  { %144 = dma.vmem_to_hbm [thread:$0]  %s142_s18, 16, %s273_s5, [#allocation4]  }
  0xcf   :  { %180 = dma.done.wait [#allocation4], 16  }
  0xd0   :  { %181 = vsyncadd [#allocation4], 4294967280 }
  0xd1   :  { %148 = vsyncpa [#allocation4], 1 }

</bundles_post_ra>
